<compile_context>
chip_gen: v5e
topology: v5e:2x2
jax: 0.10.0
libtpu: 0.0.40
codegen_flags: <defaults>
</compile_context>

<pallas_src>
import jax
import jax.numpy as jnp
from jax.experimental import pallas as pl
from jax.experimental.pallas import tpu as pltpu


# ---------------------------------------------------------------------------
# Fused kernel: all G generators + selected critic for one batch tile.
# ---------------------------------------------------------------------------
def _fused_gan_critic_kernel(x_ref, w1_ref, b1_ref, w2_ref, b2_ref,
                             wc1_ref, bc1_ref, wc2_ref, bc2_ref,
                             fakes_ref, scores_ref):
    """Blocks (activations are lane-dense 2-D):
      x_ref      (Bt, G*Din) f32   [noise|space|label] per generator, lane-concat
      w1_ref     (G, Din, H)  bf16   b1_ref (G, 1, H)    f32
      w2_ref     (G, H, Dout) bf16   b2_ref (G, 1, Dout) f32
      wc1_ref    (Dout, Hc)   bf16   bc1_ref (1, Hc) f32  wc2_ref (1, Hc) f32
      bc2_ref    (1,) f32 in SMEM
      fakes_ref  (Bt, G*Dout) f32
      scores_ref (Bt, G)      f32
    """
    num_gen, din, _ = w1_ref.shape
    bt = x_ref.shape[0]

    wc1 = wc1_ref[...]                       # (Dout, Hc) bf16, VMEM-resident
    bc1 = bc1_ref[...]                       # (1, Hc)  f32
    wc2 = wc2_ref[...]                       # (1, Hc)  f32
    bc2 = bc2_ref[0]                         # f32 scalar from SMEM

    fakes = []
    for g in range(num_gen):                 # G is a small compile-time constant
        # generator_g input: static lane slice of the concatenated block.
        x_g = x_ref[:, g * din:(g + 1) * din].astype(jnp.bfloat16)   # (Bt, Din)
        h = (jnp.dot(x_g, w1_ref[g], preferred_element_type=jnp.float32)
             + b1_ref[g])                                            # (Bt, H)
        h = jnp.maximum(h, 0.0)
        fake = (jnp.dot(h.astype(jnp.bfloat16), w2_ref[g],
                        preferred_element_type=jnp.float32)
                + b2_ref[g])                                         # (Bt, Dout)
        fakes.append(fake)

    # Lane-dense single store of all G generator outputs: (Bt, G*Dout).
    fakes_ref[...] = jnp.concatenate(fakes, axis=1).astype(fakes_ref.dtype)

    # --- critic: ONE GEMM over all generators' rows (no HBM round-trip) ---
    crit_in = jnp.concatenate(fakes, axis=0).astype(jnp.bfloat16)    # (G*Bt, Dout)
    hc = jnp.dot(crit_in, wc1, preferred_element_type=jnp.float32) + bc1
    hc = jnp.maximum(hc, 0.0)                                        # (G*Bt, Hc)
    # Layer 2 as a VPU multiply + lane reduction instead of an Hc x 1 matmul.
    s_all = jnp.sum(hc * wc2, axis=-1, keepdims=True) + bc2          # (G*Bt, 1)

    # Regroup the (g, b)-ordered rows into a lane-dense (Bt, G) tile; single store.
    scores_ref[...] = jnp.concatenate(
        [s_all[g * bt:(g + 1) * bt, :] for g in range(num_gen)], axis=1
    ).astype(scores_ref.dtype)


# ---------------------------------------------------------------------------
# Tiling / wrapper
# ---------------------------------------------------------------------------
_VMEM_LIMIT_BYTES = 32 * 1024 * 1024        # explicit scoped-VMEM limit (safe v5e/v6e/v7x)


def _round_up(x, m):
    return -(-x // m) * m


def _choose_tiling(B, G, Din, H, Dout, Hc):
    """Pick rows-per-step against the scoped-VMEM budget; pad B up to it.

    Counts double-buffered input/output blocks + (double-buffered) weights +
    rough per-row live intermediates, with a 1.5x (8,128)-padding fudge, and
    keeps >= 2 grid steps when possible so v7x megacore sharding engages.
    """
    row_io = 4 * (G * Din + G * Dout + G)                    # x + fakes + scores (f32)
    row_live = 4 * (H + 2 * G * Dout + G * Hc + G)           # rough vreg/VMEM intermediates
    w_bytes = 2 * (2 * G * Din * H + 4 * G * H
                   + 2 * G * H * Dout + 4 * G * Dout
                   + 2 * Dout * Hc + 8 * Hc + 4)
    budget = 20 * 1024 * 1024                                # headroom under 32 MiB
    b8 = _round_up(max(B, 8), 8)
    block_b = 8
    for cand in (2048, 1024, 512, 256, 128, 64, 32, 16, 8):
        if cand > b8:
            continue
        est = int((2 * cand * row_io + cand * row_live + w_bytes) * 1.5)
        if est <= budget:
            block_b = cand
            break
    # Prefer >= 2 steps on the "parallel" axis (v7x: both TensorCores busy).
    if _round_up(B, block_b) // block_b < 2 and block_b > 8:
        block_b = max(8, block_b // 2)
    b_pad = _round_up(max(B, block_b), block_b)
    return block_b, b_pad


def generator_critic_forward(noise, space, label, params, ind=0):
    """Mirrors GeneratorCritic.forward(noise, space, label, ind)."""
    W1, b1, W2, b2, Wc1s, bc1s, Wc2s, bc2s = params
    G = W1.shape[0]
    n_critics = Wc1s.shape[0]
    assert ind != -1 or n_critics == 1, \
        "you forgot to specify which critic should be used"
    # Same out-of-range fallback policy as critic_parameters().
    c_i = ind if 0 <= ind < n_critics else 0

    total = noise.shape[0]
    assert total % G == 0
    B = total // G
    Dn, Ds, Dl = noise.shape[-1], space.shape[-1], label.shape[-1]
    Din, H = W1.shape[1], W1.shape[2]
    Dout = W2.shape[-1]
    Hc = Wc1s.shape[-1]
    assert Dn + Ds + Dl == Din

    # Select the ind-th critic's parameters outside the kernel (cheap XLA slice).
    Wc1, bc1 = Wc1s[c_i], bc1s[c_i]
    wc2_row = Wc2s[c_i].reshape(1, Hc)       # (Hc, 1) -> (1, Hc), free view
    bc2_s = bc2s[c_i].reshape(1)             # scalar for SMEM

    # One cheap XLA concat; then free row-major views:
    #   x row (b*G+g) = [noise|space|label] of generator g for batch b
    #   (B, G*Din)    : row b, lanes [g*Din:(g+1)*Din] = that same input.
    x = jnp.concatenate([noise, space, label], axis=-1)          # (total, Din)
    x2d = x.reshape(B, G * Din)

    block_b, B_pad = _choose_tiling(B, G, Din, H, Dout, Hc)
    if B_pad != B:
        x2d = jnp.pad(x2d, ((0, B_pad - B), (0, 0)))             # ragged tail handled by padding
    grid = (B_pad // block_b,)

    fakes2d, scores2d = pl.pallas_call(
        _fused_gan_critic_kernel,
        out_shape=(
            jax.ShapeDtypeStruct((B_pad, G * Dout), jnp.float32),
            jax.ShapeDtypeStruct((B_pad, G), jnp.float32),
        ),
        grid_spec=pltpu.PrefetchScalarGridSpec(
            num_scalar_prefetch=0,
            grid=grid,
            in_specs=[
                # activations: lane-dense 2-D block, tiled over batch rows
                pl.BlockSpec((block_b, G * Din), lambda i: (i, 0)),
                # weights: constant index_map -> VMEM resident across steps
                pl.BlockSpec((G, Din, H), lambda i: (0, 0, 0)),
                pl.BlockSpec((G, 1, H), lambda i: (0, 0, 0)),
                pl.BlockSpec((G, H, Dout), lambda i: (0, 0, 0)),
                pl.BlockSpec((G, 1, Dout), lambda i: (0, 0, 0)),
                pl.BlockSpec((Dout, Hc), lambda i: (0, 0)),
                pl.BlockSpec((1, Hc), lambda i: (0, 0)),
                pl.BlockSpec((1, Hc), lambda i: (0, 0)),
                # 4-byte scalar -> SMEM, no VMEM tile / DMA
                pl.BlockSpec(memory_space=pltpu.MemorySpace.SMEM),
            ],
            out_specs=(
                pl.BlockSpec((block_b, G * Dout), lambda i: (i, 0)),
                pl.BlockSpec((block_b, G), lambda i: (i, 0)),
            ),
        ),
        compiler_params=pltpu.CompilerParams(
            dimension_semantics=("parallel",),
            vmem_limit_bytes=_VMEM_LIMIT_BYTES),
    )(x2d, W1, b1, W2, b2, Wc1, bc1, wc2_row, bc2_s)

    # Free row-major views: row (b*G + g) == generator_g output / score.
    fakes = fakes2d[:B].reshape(total, Dout)
    scores = scores2d[:B].reshape(total, 1)
    return fakes, scores


# ---------------------------------------------------------------------------
# Deterministic parameter init + pure-JAX reference (same precision policy)
# ---------------------------------------------------------------------------
def init_params(key, G, n_critics, Dn, Ds, Dl, H, Dout, Hc):
    Din = Dn + Ds + Dl
    ks = jax.random.split(key, 8)
    s = 0.1
    W1 = (jax.random.normal(ks[0], (G, Din, H), jnp.float32) * s).astype(jnp.bfloat16)
    b1 = jax.random.normal(ks[1], (G, 1, H), jnp.float32) * s
    W2 = (jax.random.normal(ks[2], (G, H, Dout), jnp.float32) * s).astype(jnp.bfloat16)
    b2 = jax.random.normal(ks[3], (G, 1, Dout), jnp.float32) * s
    Wc1 = (jax.random.normal(ks[4], (n_critics, Dout, Hc), jnp.float32) * s).astype(jnp.bfloat16)
    bc1 = jax.random.normal(ks[5], (n_critics, 1, Hc), jnp.float32) * s
    Wc2 = jax.random.normal(ks[6], (n_critics, Hc, 1), jnp.float32) * s
    bc2 = jax.random.normal(ks[7], (n_critics, 1, 1), jnp.float32) * s
    return (W1, b1, W2, b2, Wc1, bc1, Wc2, bc2)


def reference_forward(noise, space, label, params, ind=0):
    """Pure-JAX reference with identical (bf16 operand / f32 accum) precision."""
    W1, b1, W2, b2, Wc1s, bc1s, Wc2s, bc2s = params
    G = W1.shape[0]
    n_critics = Wc1s.shape[0]
    c_i = ind if 0 <= ind < n_critics else 0
    total = noise.shape[0]
    B = total // G
    noise_b = noise.reshape(B, G, -1)
    space_b = space.reshape(B, G, -1)
    label_b = label.reshape(B, G, -1)
    outs = []
    for g in range(G):
        x = jnp.concatenate([noise_b[:, g], space_b[:, g], label_b[:, g]],
                            axis=-1).astype(jnp.bfloat16)
        h = jnp.dot(x, W1[g], preferred_element_type=jnp.float32) + b1[g]
        h = jnp.maximum(h, 0.0)
        outs.append(jnp.dot(h.astype(jnp.bfloat16), W2[g],
                            preferred_element_type=jnp.float32) + b2[g])
    fakes = jnp.concatenate(outs, axis=1).reshape(total, -1)
    hc = jnp.dot(fakes.astype(jnp.bfloat16), Wc1s[c_i],
                 preferred_element_type=jnp.float32) + bc1s[c_i]
    hc = jnp.maximum(hc, 0.0)
    scores = (jnp.sum(hc * Wc2s[c_i].reshape(1, -1), axis=-1, keepdims=True)
              + bc2s[c_i][0, 0])
    return fakes, scores


# ---------------------------------------------------------------------------
if __name__ == "__main__":
    # Small shapes: 2 generators, 2 critics (ind=1 exercised), batch total = 8.
    G = 2
    n_critics = 2
    total = 8
    noise_dim, space_dim, label_dim = 8, 4, 4      # Din = 16
    H = 32                                         # generator hidden
    Dout = 16                                      # generator output dim
    Hc = 32                                        # critic hidden

    key = jax.random.PRNGKey(0)
    k_n, k_s, k_l, k_p = jax.random.split(key, 4)
    noise = jax.random.normal(k_n, (total, noise_dim), jnp.float32)
    space = jax.random.normal(k_s, (total, space_dim), jnp.float32)
    label = jax.random.normal(k_l, (total, label_dim), jnp.float32)
    params = init_params(k_p, G, n_critics, noise_dim, space_dim, label_dim,
                         H, Dout, Hc)

    fakes, scores = generator_critic_forward(noise, space, label, params, ind=1)
    fakes = jax.block_until_ready(fakes)
    scores = jax.block_until_ready(scores)

    ref_fakes, ref_scores = reference_forward(noise, space, label, params, ind=1)
    assert fakes.shape == (total, Dout)
    assert scores.shape == (total, 1)
    assert jnp.allclose(fakes, ref_fakes, atol=1e-3, rtol=1e-3), \
        float(jnp.max(jnp.abs(fakes - ref_fakes)))
    assert jnp.allclose(scores, ref_scores, atol=1e-3, rtol=1e-3), \
        float(jnp.max(jnp.abs(scores - ref_scores)))

    print("KERNEL_OK")
</pallas_src>

<mosaic_0001>
module attributes {stable_mosaic.version = 11 : i64} {
  func.func @_fused_gan_critic_kernel(%arg0: i32, %arg1: memref<8x32xf32, #tpu.memory_space<vmem>>, %arg2: memref<2x16x32xbf16, #tpu.memory_space<vmem>>, %arg3: memref<2x1x32xf32, #tpu.memory_space<vmem>>, %arg4: memref<2x32x16xbf16, #tpu.memory_space<vmem>>, %arg5: memref<2x1x16xf32, #tpu.memory_space<vmem>>, %arg6: memref<16x32xbf16, #tpu.memory_space<vmem>>, %arg7: memref<1x32xf32, #tpu.memory_space<vmem>>, %arg8: memref<1x32xf32, #tpu.memory_space<vmem>>, %arg9: memref<1xf32, #tpu.memory_space<smem>>, %arg10: memref<8x32xf32, #tpu.memory_space<vmem>>, %arg11: memref<8x2xf32, #tpu.memory_space<vmem>>) attributes {dimension_semantics = [#tpu.dimension_semantics<parallel>], iteration_bounds = array<i64: 1>, scalar_prefetch = 0 : i64, scratch_operands = 0 : i64, tpu.core_type = #tpu.core_type<tc>, window_params = [{transform_indices = @transform_0, window_bounds = array<i64: 8, 32>}, {pipeline_mode = #tpu.pipeline_mode<synchronous>, transform_indices = @transform_1, window_bounds = array<i64: 2, 16, 32>}, {pipeline_mode = #tpu.pipeline_mode<synchronous>, transform_indices = @transform_2, window_bounds = array<i64: 2, 1, 32>}, {pipeline_mode = #tpu.pipeline_mode<synchronous>, transform_indices = @transform_3, window_bounds = array<i64: 2, 32, 16>}, {pipeline_mode = #tpu.pipeline_mode<synchronous>, transform_indices = @transform_4, window_bounds = array<i64: 2, 1, 16>}, {pipeline_mode = #tpu.pipeline_mode<synchronous>, transform_indices = @transform_5, window_bounds = array<i64: 16, 32>}, {pipeline_mode = #tpu.pipeline_mode<synchronous>, transform_indices = @transform_6, window_bounds = array<i64: 1, 32>}, {pipeline_mode = #tpu.pipeline_mode<synchronous>, transform_indices = @transform_7, window_bounds = array<i64: 1, 32>}, {transform_indices = @transform_8, window_bounds = array<i64: 1>}, {transform_indices = @transform_9, window_bounds = array<i64: 8, 32>}, {transform_indices = @transform_10, window_bounds = array<i64: 8, 2>}]} {
    %c0 = arith.constant 0 : index
    %c0_0 = arith.constant 0 : index
    %0 = vector.load %arg6[%c0, %c0_0] : memref<16x32xbf16, #tpu.memory_space<vmem>>, vector<16x32xbf16>
    %c0_1 = arith.constant 0 : index
    %c0_2 = arith.constant 0 : index
    %1 = vector.load %arg7[%c0_1, %c0_2] : memref<1x32xf32, #tpu.memory_space<vmem>>, vector<1x32xf32>
    %c0_3 = arith.constant 0 : index
    %c0_4 = arith.constant 0 : index
    %2 = vector.load %arg8[%c0_3, %c0_4] : memref<1x32xf32, #tpu.memory_space<vmem>>, vector<1x32xf32>
    %c0_5 = arith.constant 0 : index
    %3 = memref.load %arg9[%c0_5] : memref<1xf32, #tpu.memory_space<smem>>
    %c0_6 = arith.constant 0 : index
    %c0_7 = arith.constant 0 : index
    %4 = vector.load %arg1[%c0_6, %c0_7] : memref<8x32xf32, #tpu.memory_space<vmem>>, vector<8x16xf32>
    %5 = arith.truncf %4 : vector<8x16xf32> to vector<8x16xbf16>
    %c0_8 = arith.constant 0 : index
    %c0_9 = arith.constant 0 : index
    %c0_10 = arith.constant 0 : index
    %6 = vector.load %arg2[%c0_8, %c0_9, %c0_10] : memref<2x16x32xbf16, #tpu.memory_space<vmem>>, vector<1x16x32xbf16>
    %7 = vector.shape_cast %6 : vector<1x16x32xbf16> to vector<16x32xbf16>
    %cst = arith.constant dense<0.000000e+00> : vector<8x32xf32>
    %8 = tpu.matmul %5, %7, %cst {dimension_numbers = #tpu.dot_dimension_numbers<[1], [0], [0], [1], [0, 0, 1, 1], [], []>} : vector<8x16xbf16>, vector<16x32xbf16>, vector<8x32xf32> -> vector<8x32xf32>
    %c0_11 = arith.constant 0 : index
    %c0_12 = arith.constant 0 : index
    %c0_13 = arith.constant 0 : index
    %9 = vector.load %arg3[%c0_11, %c0_12, %c0_13] : memref<2x1x32xf32, #tpu.memory_space<vmem>>, vector<1x1x32xf32>
    %10 = vector.shape_cast %9 : vector<1x1x32xf32> to vector<1x32xf32>
    %11 = vector.broadcast %10 : vector<1x32xf32> to vector<8x32xf32>
    %12 = arith.addf %8, %11 : vector<8x32xf32>
    %cst_14 = arith.constant 0.000000e+00 : f32
    %13 = vector.broadcast %cst_14 : f32 to vector<8x32xf32>
    %14 = arith.maximumf %12, %13 : vector<8x32xf32>
    %15 = arith.truncf %14 : vector<8x32xf32> to vector<8x32xbf16>
    %c0_15 = arith.constant 0 : index
    %c0_16 = arith.constant 0 : index
    %c0_17 = arith.constant 0 : index
    %16 = vector.load %arg4[%c0_15, %c0_16, %c0_17] : memref<2x32x16xbf16, #tpu.memory_space<vmem>>, vector<1x32x16xbf16>
    %17 = vector.shape_cast %16 : vector<1x32x16xbf16> to vector<32x16xbf16>
    %cst_18 = arith.constant dense<0.000000e+00> : vector<8x16xf32>
    %18 = tpu.matmul %15, %17, %cst_18 {dimension_numbers = #tpu.dot_dimension_numbers<[1], [0], [0], [1], [0, 0, 1, 1], [], []>} : vector<8x32xbf16>, vector<32x16xbf16>, vector<8x16xf32> -> vector<8x16xf32>
    %c0_19 = arith.constant 0 : index
    %c0_20 = arith.constant 0 : index
    %c0_21 = arith.constant 0 : index
    %19 = vector.load %arg5[%c0_19, %c0_20, %c0_21] : memref<2x1x16xf32, #tpu.memory_space<vmem>>, vector<1x1x16xf32>
    %20 = vector.shape_cast %19 : vector<1x1x16xf32> to vector<1x16xf32>
    %21 = vector.broadcast %20 : vector<1x16xf32> to vector<8x16xf32>
    %22 = arith.addf %18, %21 : vector<8x16xf32>
    %c0_22 = arith.constant 0 : index
    %c16 = arith.constant 16 : index
    %23 = vector.load %arg1[%c0_22, %c16] : memref<8x32xf32, #tpu.memory_space<vmem>>, vector<8x16xf32>
    %24 = arith.truncf %23 : vector<8x16xf32> to vector<8x16xbf16>
    %c1 = arith.constant 1 : index
    %c0_23 = arith.constant 0 : index
    %c0_24 = arith.constant 0 : index
    %25 = vector.load %arg2[%c1, %c0_23, %c0_24] : memref<2x16x32xbf16, #tpu.memory_space<vmem>>, vector<1x16x32xbf16>
    %26 = vector.shape_cast %25 : vector<1x16x32xbf16> to vector<16x32xbf16>
    %cst_25 = arith.constant dense<0.000000e+00> : vector<8x32xf32>
    %27 = tpu.matmul %24, %26, %cst_25 {dimension_numbers = #tpu.dot_dimension_numbers<[1], [0], [0], [1], [0, 0, 1, 1], [], []>} : vector<8x16xbf16>, vector<16x32xbf16>, vector<8x32xf32> -> vector<8x32xf32>
    %c1_26 = arith.constant 1 : index
    %c0_27 = arith.constant 0 : index
    %c0_28 = arith.constant 0 : index
    %28 = vector.load %arg3[%c1_26, %c0_27, %c0_28] : memref<2x1x32xf32, #tpu.memory_space<vmem>>, vector<1x1x32xf32>
    %29 = vector.shape_cast %28 : vector<1x1x32xf32> to vector<1x32xf32>
    %30 = vector.broadcast %29 : vector<1x32xf32> to vector<8x32xf32>
    %31 = arith.addf %27, %30 : vector<8x32xf32>
    %cst_29 = arith.constant 0.000000e+00 : f32
    %32 = vector.broadcast %cst_29 : f32 to vector<8x32xf32>
    %33 = arith.maximumf %31, %32 : vector<8x32xf32>
    %34 = arith.truncf %33 : vector<8x32xf32> to vector<8x32xbf16>
    %c1_30 = arith.constant 1 : index
    %c0_31 = arith.constant 0 : index
    %c0_32 = arith.constant 0 : index
    %35 = vector.load %arg4[%c1_30, %c0_31, %c0_32] : memref<2x32x16xbf16, #tpu.memory_space<vmem>>, vector<1x32x16xbf16>
    %36 = vector.shape_cast %35 : vector<1x32x16xbf16> to vector<32x16xbf16>
    %cst_33 = arith.constant dense<0.000000e+00> : vector<8x16xf32>
    %37 = tpu.matmul %34, %36, %cst_33 {dimension_numbers = #tpu.dot_dimension_numbers<[1], [0], [0], [1], [0, 0, 1, 1], [], []>} : vector<8x32xbf16>, vector<32x16xbf16>, vector<8x16xf32> -> vector<8x16xf32>
    %c1_34 = arith.constant 1 : index
    %c0_35 = arith.constant 0 : index
    %c0_36 = arith.constant 0 : index
    %38 = vector.load %arg5[%c1_34, %c0_35, %c0_36] : memref<2x1x16xf32, #tpu.memory_space<vmem>>, vector<1x1x16xf32>
    %39 = vector.shape_cast %38 : vector<1x1x16xf32> to vector<1x16xf32>
    %40 = vector.broadcast %39 : vector<1x16xf32> to vector<8x16xf32>
    %41 = arith.addf %37, %40 : vector<8x16xf32>
    %42 = tpu.concatenate %22, %41 in 1 : vector<8x16xf32>, vector<8x16xf32> -> vector<8x32xf32>
    %c0_37 = arith.constant 0 : index
    %c0_38 = arith.constant 0 : index
    %43 = vector.load %arg10[%c0_37, %c0_38] : memref<8x32xf32, #tpu.memory_space<vmem>>, vector<8x32xf32>
    tpu.vector_store %arg10[%c0_37, %c0_38], %42 {strides = array<i32>} : memref<8x32xf32, #tpu.memory_space<vmem>>, vector<8x32xf32>,
    %44 = tpu.concatenate %22, %41 in 0 : vector<8x16xf32>, vector<8x16xf32> -> vector<16x16xf32>
    %45 = arith.truncf %44 : vector<16x16xf32> to vector<16x16xbf16>
    %cst_39 = arith.constant dense<0.000000e+00> : vector<16x32xf32>
    %46 = tpu.matmul %45, %0, %cst_39 {dimension_numbers = #tpu.dot_dimension_numbers<[1], [0], [0], [1], [0, 0, 1, 1], [], []>} : vector<16x16xbf16>, vector<16x32xbf16>, vector<16x32xf32> -> vector<16x32xf32>
    %47 = vector.broadcast %1 : vector<1x32xf32> to vector<16x32xf32>
    %48 = arith.addf %46, %47 : vector<16x32xf32>
    %cst_40 = arith.constant 0.000000e+00 : f32
    %49 = vector.broadcast %cst_40 : f32 to vector<16x32xf32>
    %50 = arith.maximumf %48, %49 : vector<16x32xf32>
    %51 = vector.broadcast %2 : vector<1x32xf32> to vector<16x32xf32>
    %52 = arith.mulf %50, %51 : vector<16x32xf32>
    %cst_41 = arith.constant dense<0.000000e+00> : vector<16xf32>
    %53 = vector.multi_reduction <add>, %52, %cst_41 [1] : vector<16x32xf32> to vector<16xf32>
    %54 = vector.shape_cast %53 : vector<16xf32> to vector<16x1xf32>
    %55 = vector.broadcast %3 : f32 to vector<16x1xf32>
    %56 = arith.addf %54, %55 : vector<16x1xf32>
    %57 = vector.extract_strided_slice %56 {offsets = [0, 0], sizes = [8, 1], strides = [1, 1]} : vector<16x1xf32> to vector<8x1xf32>
    %58 = vector.extract_strided_slice %56 {offsets = [8, 0], sizes = [8, 1], strides = [1, 1]} : vector<16x1xf32> to vector<8x1xf32>
    %59 = tpu.concatenate %57, %58 in 1 : vector<8x1xf32>, vector<8x1xf32> -> vector<8x2xf32>
    %c0_42 = arith.constant 0 : index
    %c0_43 = arith.constant 0 : index
    %60 = vector.load %arg11[%c0_42, %c0_43] : memref<8x2xf32, #tpu.memory_space<vmem>>, vector<8x2xf32>
    tpu.vector_store %arg11[%c0_42, %c0_43], %59 {strides = array<i32>} : memref<8x2xf32, #tpu.memory_space<vmem>>, vector<8x2xf32>,
    return
  }
  func.func @transform_0(%arg0: i32) -> (i32, i32) {
    %c0_i32 = arith.constant 0 : i32
    %c0_i32_0 = arith.constant 0 : i32
    return %arg0, %c0_i32 : i32, i32
  }
  func.func @transform_1(%arg0: i32) -> (i32, i32, i32) {
    %c0_i32 = arith.constant 0 : i32
    %c0_i32_0 = arith.constant 0 : i32
    %c0_i32_1 = arith.constant 0 : i32
    %c0_i32_2 = arith.constant 0 : i32
    return %c0_i32, %c0_i32_0, %c0_i32_1 : i32, i32, i32
  }
  func.func @transform_2(%arg0: i32) -> (i32, i32, i32) {
    %c0_i32 = arith.constant 0 : i32
    %c0_i32_0 = arith.constant 0 : i32
    %c0_i32_1 = arith.constant 0 : i32
    %c0_i32_2 = arith.constant 0 : i32
    return %c0_i32, %c0_i32_0, %c0_i32_1 : i32, i32, i32
  }
  func.func @transform_3(%arg0: i32) -> (i32, i32, i32) {
    %c0_i32 = arith.constant 0 : i32
    %c0_i32_0 = arith.constant 0 : i32
    %c0_i32_1 = arith.constant 0 : i32
    %c0_i32_2 = arith.constant 0 : i32
    return %c0_i32, %c0_i32_0, %c0_i32_1 : i32, i32, i32
  }
  func.func @transform_4(%arg0: i32) -> (i32, i32, i32) {
    %c0_i32 = arith.constant 0 : i32
    %c0_i32_0 = arith.constant 0 : i32
    %c0_i32_1 = arith.constant 0 : i32
    %c0_i32_2 = arith.constant 0 : i32
    return %c0_i32, %c0_i32_0, %c0_i32_1 : i32, i32, i32
  }
  func.func @transform_5(%arg0: i32) -> (i32, i32) {
    %c0_i32 = arith.constant 0 : i32
    %c0_i32_0 = arith.constant 0 : i32
    %c0_i32_1 = arith.constant 0 : i32
    return %c0_i32, %c0_i32_0 : i32, i32
  }
  func.func @transform_6(%arg0: i32) -> (i32, i32) {
    %c0_i32 = arith.constant 0 : i32
    %c0_i32_0 = arith.constant 0 : i32
    %c0_i32_1 = arith.constant 0 : i32
    return %c0_i32, %c0_i32_0 : i32, i32
  }
  func.func @transform_7(%arg0: i32) -> (i32, i32) {
    %c0_i32 = arith.constant 0 : i32
    %c0_i32_0 = arith.constant 0 : i32
    %c0_i32_1 = arith.constant 0 : i32
    return %c0_i32, %c0_i32_0 : i32, i32
  }
  func.func @transform_8(%arg0: i32) -> i32 {
    %c0_i32 = arith.constant 0 : i32
    %c0_i32_0 = arith.constant 0 : i32
    return %c0_i32 : i32
  }
  func.func @transform_9(%arg0: i32) -> (i32, i32) {
    %c0_i32 = arith.constant 0 : i32
    %c0_i32_0 = arith.constant 0 : i32
    return %arg0, %c0_i32 : i32, i32
  }
  func.func @transform_10(%arg0: i32) -> (i32, i32) {
    %c0_i32 = arith.constant 0 : i32
    %c0_i32_0 = arith.constant 0 : i32
    return %arg0, %c0_i32 : i32, i32
  }
}

</mosaic_0001>

<bundles_post_ra>
// kernel: tpu_custom_call.1
= control target key start
LH: loop header
LB: loop body
LE: loop exit
PB: predicated region body
PF: predicated region fallthrough
CT: control target
= control target key end

     0   :  { %s459_s0 = inlined_call_operand.vmem [shape: f32[8,32], index: 0, kind: input, shape index: {}]   ;;  %s460_s1 = inlined_call_operand.vmem [shape: bf16[2,16,32], index: 1, kind: input, shape index: {}]   ;;  %s461_s2 = inlined_call_operand.vmem [shape: f32[2,1,32], index: 2, kind: input, shape index: {}]   ;;  %s462_s3 = inlined_call_operand.vmem [shape: bf16[2,32,16], index: 3, kind: input, shape index: {}]   ;;  %s463_s4 = inlined_call_operand.vmem [shape: f32[2,1,16], index: 4, kind: input, shape index: {}]   ;;  %s464_s5 = inlined_call_operand.vmem [shape: bf16[16,32], index: 5, kind: input, shape index: {}]   ;;  %s465_s6 = inlined_call_operand.vmem [shape: f32[1,32], index: 6, kind: input, shape index: {}]   ;;  %s466_s7 = inlined_call_operand.vmem [shape: f32[1,32], index: 7, kind: input, shape index: {}]   ;;  %s467_s8 = inlined_call_operand.<no memory space> [shape: f32[1], index: 8, kind: input, shape index: {}]   ;;  %s468_s9 = inlined_call_operand.hbm [shape: f32[8,32], index: 9, kind: output, shape index: {0}]   ;;  %s469_s10 = inlined_call_operand.vmem [shape: f32[8,2], index: 10, kind: output, shape index: {1}]  }
   0x1   :  { %v42_v0 = vld [vmem:[%s459_s0] sm:$0xff]  ;;  %v303_v1 = vld [vmem:[%s460_s1 + $0x8] sm:$0xff] }
   0x2   :  { %v43_v2 = vpack.c.bf16 %v42_v0, %v42_v0  ;;  %139 = vmatpush.bf16.msra.mxu2 %v303_v1 }
   0x3   :  { %17 = vsyncpa [#allocation4], 0  ;;  %s341_s17 = smov 112   ;;  %v300_v3 = vld [vmem:[%s460_s1] sm:$0xff]  ;;  %vm56_vm0 = vcmask 130048   ;;  %v302_v5 = vld [vmem:[%s462_s3 + $0x8] sm:$0xff]  ;;  %v231_v43 = vstv %s467_s8 }
   0x4   :  { %121 = vrot.lane.b32.xlu0 %v43_v2, %s341_s17  ;;  %67 = vmatpush.bf16.msra.mxu0 %v300_v3  ;;  %v309_v6 = vld [vmem:[%s461_s2] ss:$0 sm:$0xff]  ;;  %v305_v8 = vld [vmem:[%s462_s3 + $0x18] sm:$0xff]  ;;  %v304_v12 = vld [vmem:[%s462_s3 + $0x10] sm:$0xff]  ;;  %vm95_vm1 = vcmask 261120   ;;  %vm234_vm2 = vcmask 7168  }
   0x5   :  { %105 = vmatpush.bf16.msra.mxu1 %v302_v5  ;;  %178 = vmatpush.bf16.msra.mxu3 %v305_v8  ;;  %v301_v10 = vld [vmem:[%s462_s3] sm:$0xff]  ;;  %vm236_vm3 = vcmask 15360   ;;  %s343_s19 = smov [#allocation3]   ;;  %s245_s22 = sshll.u32 %s468_s9, 4  ;;  %s246_s22 = int_to_ptr.hbm [resolvable:$true] %s245_s22 }
   0x6   :  { %v299_v15 = vld [vmem:[%s464_s5] sm:$0xff]  ;;  %s243_s0 = sshll.u32 %s343_s19, 4  ;;  %s244_s0 = int_to_ptr.vmem [resolvable:$true] %s243_s0 }
   0x7   :  { %262 = vmatmul.msk.bf16.vlgmr.msra.gmra.mxu0 %vm56_vm0, %v43_v2  ;;  %v310_v16 = vld [vmem:[%s461_s2 + $0x1] ss:$0 sm:$0xff]  ;;  %v311_v24 = vld [vmem:[%s463_s4] ss:$0 sm:$0xff] }
   0x8   :  { %211 = vmatpush.bf16.msrb.mxu0 %v299_v15  ;;  %v312_v25 = vld [vmem:[%s463_s4 + $0x1] ss:$0 sm:$0xff]  ;;  %v313_v31 = vld [vmem:[%s465_s6] ss:$0 sm:$0xff]  ;;  %s342_s4 = smov 16  }
   0x9   :  { %106 = vmatpush.bf16.msra.mxu1 %v301_v10  ;;  %179 = vmatpush.bf16.msra.mxu3 %v304_v12  ;;  %v314_v34 = vld [vmem:[%s466_s7] ss:$0 sm:$0xff] }
  0x76   :  { %v122_v4 = vpop.permute.xlu0 %121 }
  0x77   :  { %279 = vmatmul.msk.bf16.vlgmr.msra.gmra.mxu2 %vm56_vm0, %v122_v4 }
  0x84   :  { %v69_v7 = vpop.f32.mrf.mxu0 }
  0x85   :  { %v70_v9 = vadd.f32 %v309_v6, %v69_v7 }
  0x87   :  { %v73_v11 = vmax.f32 %v70_v9, 0.0 }
  0x89   :  { %v74_v13 = vpack.c.bf16 %v73_v11, %v73_v11 }
  0x8b   :  { %271 = vmatmul.msk.bf16.vlgmr.msra.gmra.mxu1 %vm95_vm1, %v74_v13 }
  0x8c   :  { %v71_v14 = vpop.f32.mrf.mxu0 }
  0xfa   :  { %v141_v17 = vpop.f32.mrf.mxu2 }
  0xfb   :  { %v142_v18 = vadd.f32 %v310_v16, %v141_v17 }
  0xfd   :  { %v145_v19 = vmax.f32 %v142_v18, 0.0 }
  0xff   :  { %v146_v20 = vpack.c.bf16 %v145_v19, %v145_v19 }
 0x101   :  { %293 = vmatmul.msk.bf16.vlgmr.msra.gmra.mxu3 %vm95_vm1, %v146_v20 }
 0x102   :  { %v143_v21 = vpop.f32.mrf.mxu2 }
 0x108   :  { %v108_v22 = vpop.f32.mrf.mxu1 }
 0x109   :  { %v109_v26 = vadd.f32 %v311_v24, %v108_v22 }
 0x110   :  { %v110_v23 = vpop.f32.mrf.mxu1 }
 0x184   :  { %v181_v27 = vpop.f32.mrf.mxu3 }
 0x185   :  { %v182_v28 = vadd.f32 %v312_v25, %v181_v27 }
 0x187   :  { %v191_v29 = vpack.c.bf16 %v182_v28, %v109_v26 }
 0x189   :  { %298 = vmatmul.msk.bf16.vlgmr.msrb.gmra.mxu0 %vm56_vm0, %v191_v29 }
 0x18c   :  { %v183_v30 = vpop.f32.mrf.mxu3 }
 0x206   :  { %v213_v32 = vpop.f32.mrf.mxu0 }
 0x207   :  { %v214_v33 = vadd.f32 %v313_v31, %v213_v32 }
 0x209   :  { %v218_v35 = vmax.f32 %v214_v33, 0.0 }
 0x20b   :  { %v223_v36 = vmul.f32 %v314_v34, %v218_v35 }
 0x20d   :  { %v225_v37 = vsel %vm95_vm1, %v223_v36, 0.0 }
 0x20e   :  { %v215_v38 = vpop.f32.mrf.mxu0  ;;  %226 = vadd.xlane.f32.xlu0 %v225_v37 }
 0x20f   :  { %v216_v39 = vadd.f32 %v313_v31, %v215_v38 }
 0x211   :  { %v219_v40 = vmax.f32 %v216_v39, 0.0 }
 0x213   :  { %v224_v41 = vmul.f32 %v314_v34, %v219_v40 }
 0x215   :  { %v228_v42 = vsel %vm95_vm1, %v224_v41, 0.0 }
 0x216   :  { %229 = vadd.xlane.f32.xlu1 %v228_v42 }
 0x22f   :  { %186 = vrot.lane.b32.xlu1 %v182_v28, %s342_s4 }
 0x281   :  { %v227_v44 = vpop.xlane.xlu0 %226 }
 0x282   :  { %v232_v46 = vadd.f32 %v231_v43, %v227_v44 }
 0x289   :  { %v230_v45 = vpop.xlane.xlu1 %229 }
 0x28a   :  { %v233_v47 = vadd.f32 %v231_v43, %v230_v45 }
 0x28c   :  { %v235_v48 = vsel %vm234_vm2, %v232_v46, %v233_v47 }
 0x28d   :  { %237 = vst.msk [vmem:[%s469_s10] sm:$0xff] %vm236_vm3, %v235_v48 }
 0x2a1   :  { %v187_v49 = vpop.permute.xlu1 %186 }
 0x2a2   :  { %v189_v50 = vsel %vm56_vm0, %v109_v26, %v187_v49 }
 0x2a3   :  { %190 = vst.msk [vmem:[#allocation3] sm:$0xff] %vm95_vm1, %v189_v50 }
 0x2a4   :  { %248 = dma.vmem_to_hbm [thread:$0]  %s244_s0, 128, %s246_s22, [#allocation4]  }
 0x2a5   :  { %339 = dma.done.wait [#allocation4], 128  }
 0x2a6   :  { %340 = vsyncadd [#allocation4], 4294967168 }
 0x2a7   :  { %257 = vsyncpa [#allocation4], 1 }

</bundles_post_ra>
